<compile_context>
chip_gen: v7x
topology: tpu7x:2x2x1
jax: 0.10.0
libtpu: 0.0.40
codegen_flags: <defaults>
</compile_context>

<pallas_src>
import functools

import jax
import jax.numpy as jnp
from jax import lax
from jax.experimental import pallas as pl
from jax.experimental.pallas import tpu as pltpu


def _round_up(x: int, m: int) -> int:
    return ((x + m - 1) // m) * m


def _fc_kernel(x_ref, w_ref, *refs, apply_relu: bool, has_bias: bool,
               acc_in_out: bool, k_rem: int):
    """One (tm, tn) output tile; grid = (M/tm, N/tn, K/tk), K innermost.

    x_ref : (tm, tk) activation tile
    w_ref : (tn, tk) weight tile in torch nn.Linear (N, K) layout (no transpose)
    refs  : ([bias (1, tn)], out (tm, tn) [, acc (tm, tn) f32 scratch])
    """
    idx = 0
    b_ref = None
    if has_bias:
        b_ref = refs[idx]
        idx += 1
    o_ref = refs[idx]
    idx += 1
    acc_ref = o_ref if acc_in_out else refs[idx]

    k = pl.program_id(2)
    nk = pl.num_programs(2)

    @pl.when(k == 0)
    def _():
        acc_ref[...] = jnp.zeros_like(acc_ref)

    def contract(x, w):
        # (tm, tk) x (tn, tk) -> (tm, tn); contraction over dim 1 of both.
        # The MXU handles the transposed-RHS layout natively.
        return lax.dot_general(x, w, (((1,), (1,)), ((), ())),
                               preferred_element_type=jnp.float32)

    if k_rem == 0:
        acc_ref[...] += contract(x_ref[...], w_ref[...])
    else:
        # K is not a multiple of tk: the trailing part of the last K block is
        # garbage (out-of-bounds read), so zero it before feeding the MXU.
        @pl.when(k < nk - 1)
        def _():
            acc_ref[...] += contract(x_ref[...], w_ref[...])

        @pl.when(k == nk - 1)
        def _():
            x = x_ref[...]
            w = w_ref[...]
            xm = lax.broadcasted_iota(jnp.int32, x.shape, 1) < k_rem
            wm = lax.broadcasted_iota(jnp.int32, w.shape, 1) < k_rem
            acc_ref[...] += contract(jnp.where(xm, x, 0), jnp.where(wm, w, 0))

    # Fused epilogue on the final K step: bias + activation + cast on store.
    if has_bias or apply_relu or not acc_in_out:
        @pl.when(k == nk - 1)
        def _():
            acc = acc_ref[...]
            if has_bias:
                acc = acc + b_ref[...].astype(jnp.float32)
            if apply_relu:
                acc = jnp.maximum(acc, 0.0)
            o_ref[...] = acc.astype(o_ref.dtype)


def fully_connected_block(x, weight, bias=None, *, activation="relu",
                          tm: int = 512, tn: int = 512, tk: int = 2048):
    """Forward of FullyConnectedBlock: activation(x @ weight.T + bias).

    x:      (..., dim_in)
    weight: (dim_out, dim_in)   -- torch.nn.Linear layout (used as-is)
    bias:   (dim_out,) or None
    """
    if activation in ("relu", jax.nn.relu):
        apply_relu = True
    elif activation in (None, "identity", "none"):
        apply_relu = False
    else:
        # TODO(synk): only ReLU / Identity epilogues are fused; other torch
        # activation modules would need their own epilogue branch.
        raise ValueError(f"unsupported activation: {activation!r}")

    orig_batch = x.shape[:-1]
    K = x.shape[-1]
    N, Kw = weight.shape
    assert Kw == K, (weight.shape, x.shape)
    out_dtype = x.dtype
    has_bias = bias is not None

    x2 = x.reshape(-1, K)
    M = x2.shape[0]

    # ---- tile selection (no wrapper-side padding or transpose) -------------
    tm = min(tm, _round_up(M, 8))
    if N <= 128:
        tn = 128
    else:
        tn = min(tn, _round_up(N, 256))      # v6e/v7x MXU is 256-wide
    if K <= tk:
        tk = K                               # single K step, no remainder
    else:
        tk = _round_up(tk, 256)

    # Keep the parallel (i, j) grid >= 2 blocks when possible so both v7x
    # TensorCores get work (harmless on single-core v5e/v6e).
    if pl.cdiv(M, tm) * pl.cdiv(N, tn) == 1:
        if N > 256:
            tn = _round_up(pl.cdiv(N, 2), 256)
        elif M > 8:
            tm = _round_up(pl.cdiv(M, 2), 8)

    acc_in_out = (out_dtype == jnp.float32)
    in_bytes = jnp.dtype(x.dtype).itemsize
    w_bytes = jnp.dtype(weight.dtype).itemsize
    out_bytes = jnp.dtype(out_dtype).itemsize

    # ---- generation-aware VMEM budget ---------------------------------------
    try:
        vmem_cap = int(getattr(pltpu.get_tpu_info(), "vmem_capacity_bytes",
                               128 << 20))
    except Exception:
        vmem_cap = 128 << 20                 # conservative default
    vmem_limit = int(min(96 << 20, (vmem_cap * 3) // 4))   # 96 MiB / 48 MiB(v7x)

    def est_vmem(tk_):
        e = 2 * tm * tk_ * in_bytes          # x tiles, double-buffered
        e += 2 * tn * tk_ * w_bytes          # W tiles, double-buffered
        e += 2 * tm * tn * out_bytes         # out tiles, double-buffered
        if has_bias:
            e += 2 * 8 * tn * 4              # bias tiles (sublane-padded)
        if not acc_in_out:
            e += tm * tn * 4                 # f32 accumulator scratch
        return e

    while est_vmem(tk) > (vmem_limit * 7) // 10 and tk > 256:
        tk = max(256, _round_up(tk // 2, 256))

    k_rem = K % tk
    grid = (pl.cdiv(M, tm), pl.cdiv(N, tn), pl.cdiv(K, tk))

    kernel = functools.partial(_fc_kernel, apply_relu=apply_relu,
                               has_bias=has_bias, acc_in_out=acc_in_out,
                               k_rem=k_rem)

    in_specs = [
        pl.BlockSpec((tm, tk), lambda i, j, k: (i, k)),    # x tile
        pl.BlockSpec((tn, tk), lambda i, j, k: (j, k)),    # W tile, (N, K) layout
    ]
    operands = [x2, weight]
    if has_bias:
        in_specs.append(pl.BlockSpec((1, tn), lambda i, j, k: (0, j)))
        operands.append(bias.reshape(1, N))

    scratch_shapes = []
    if not acc_in_out:
        scratch_shapes.append(pltpu.VMEM((tm, tn), jnp.float32))

    out = pl.pallas_call(
        kernel,
        out_shape=jax.ShapeDtypeStruct((M, N), out_dtype),
        grid_spec=pltpu.PrefetchScalarGridSpec(
            num_scalar_prefetch=0,
            grid=grid,
            in_specs=in_specs,
            out_specs=pl.BlockSpec((tm, tn), lambda i, j, k: (i, j)),
            scratch_shapes=scratch_shapes,
        ),
        compiler_params=pltpu.CompilerParams(
            dimension_semantics=("parallel", "parallel", "arbitrary"),
            vmem_limit_bytes=vmem_limit,
        ),
    )(*operands)

    return out.reshape(*orig_batch, N)


if __name__ == "__main__":
    key = jax.random.PRNGKey(0)
    k1, k2, k3, k4, k5 = jax.random.split(key, 5)

    # --- case 1: module-like shapes (batch=2, seq=8, hidden=32), ReLU + bias
    dim_in, dim_out = 32, 32
    x = jax.random.normal(k1, (2, 8, dim_in), dtype=jnp.float32)
    bound = 1.0 / (dim_in ** 0.5)   # torch.nn.Linear default init range
    w = jax.random.uniform(k2, (dim_out, dim_in), jnp.float32, -bound, bound)
    b = jax.random.uniform(k3, (dim_out,), jnp.float32, -bound, bound)

    y = fully_connected_block(x, w, b, activation="relu")
    y = jax.block_until_ready(y)
    y_ref = jnp.maximum(jnp.einsum("bsk,nk->bsn", x, w) + b, 0.0)
    assert y.shape == y_ref.shape and y.dtype == x.dtype
    assert jnp.allclose(y, y_ref, atol=1e-4, rtol=1e-4)

    # --- case 2: no bias, identity activation, K remainder path (small tk)
    dim_in2, dim_out2 = 200, 96
    x2 = jax.random.normal(k4, (2, 8, dim_in2), dtype=jnp.float32)
    w2 = jax.random.normal(k5, (dim_out2, dim_in2), dtype=jnp.float32) * 0.05
    y2 = fully_connected_block(x2, w2, None, activation=None, tk=128)
    y2 = jax.block_until_ready(y2)
    y2_ref = jnp.einsum("bsk,nk->bsn", x2, w2)
    assert y2.shape == y2_ref.shape and y2.dtype == x2.dtype
    assert jnp.allclose(y2, y2_ref, atol=1e-4, rtol=1e-4)

    print("KERNEL_OK")
</pallas_src>

<mosaic_0001>
module attributes {stable_mosaic.version = 11 : i64} {
  func.func @_fc_kernel(%arg0: i32, %arg1: i32, %arg2: i32, %arg3: memref<8x32xf32, #tpu.memory_space<vmem>>, %arg4: memref<128x32xf32, #tpu.memory_space<vmem>>, %arg5: memref<1x128xf32, #tpu.memory_space<vmem>>, %arg6: memref<8x128xf32, #tpu.memory_space<vmem>>) attributes {dimension_semantics = [#tpu.dimension_semantics<parallel>, #tpu.dimension_semantics<parallel>, #tpu.dimension_semantics<arbitrary>], iteration_bounds = array<i64: 2, 1, 1>, scalar_prefetch = 0 : i64, scratch_operands = 0 : i64, tpu.core_type = #tpu.core_type<tc>, window_params = [{transform_indices = @transform_0, window_bounds = array<i64: 8, 32>}, {transform_indices = @transform_1, window_bounds = array<i64: 128, 32>}, {transform_indices = @transform_2, window_bounds = array<i64: 1, 128>}, {transform_indices = @transform_3, window_bounds = array<i64: 8, 128>}]} {
    %c0_i32 = arith.constant 0 : i32
    %0 = arith.cmpi eq, %arg2, %c0_i32 : i32
    %1 = arith.extui %0 : i1 to i32
    %c0_i32_0 = arith.constant 0 : i32
    %2 = arith.cmpi ne, %1, %c0_i32_0 : i32
    scf.if %2 {
      %cst_10 = arith.constant 0.000000e+00 : f32
      %12 = vector.broadcast %cst_10 : f32 to vector<8x128xf32>
      %c0_11 = arith.constant 0 : index
      %c0_12 = arith.constant 0 : index
      %13 = vector.load %arg6[%c0_11, %c0_12] : memref<8x128xf32, #tpu.memory_space<vmem>>, vector<8x128xf32>
      tpu.vector_store %arg6[%c0_11, %c0_12], %12 {strides = array<i32>} : memref<8x128xf32, #tpu.memory_space<vmem>>, vector<8x128xf32>,
    } else {
    }
    %c0 = arith.constant 0 : index
    %c0_1 = arith.constant 0 : index
    %3 = vector.load %arg6[%c0, %c0_1] : memref<8x128xf32, #tpu.memory_space<vmem>>, vector<8x128xf32>
    %c0_2 = arith.constant 0 : index
    %c0_3 = arith.constant 0 : index
    %4 = vector.load %arg3[%c0_2, %c0_3] : memref<8x32xf32, #tpu.memory_space<vmem>>, vector<8x32xf32>
    %c0_4 = arith.constant 0 : index
    %c0_5 = arith.constant 0 : index
    %5 = vector.load %arg4[%c0_4, %c0_5] : memref<128x32xf32, #tpu.memory_space<vmem>>, vector<128x32xf32>
    %cst = arith.constant dense<0.000000e+00> : vector<8x128xf32>
    %6 = tpu.matmul %4, %5, %cst {dimension_numbers = #tpu.dot_dimension_numbers<[1], [1], [0], [0], [0, 0, 1, 0], [], []>} : vector<8x32xf32>, vector<128x32xf32>, vector<8x128xf32> -> vector<8x128xf32>
    %7 = arith.addf %3, %6 : vector<8x128xf32>
    %c0_6 = arith.constant 0 : index
    %c0_7 = arith.constant 0 : index
    %8 = vector.load %arg6[%c0_6, %c0_7] : memref<8x128xf32, #tpu.memory_space<vmem>>, vector<8x128xf32>
    tpu.vector_store %arg6[%c0_6, %c0_7], %7 {strides = array<i32>} : memref<8x128xf32, #tpu.memory_space<vmem>>, vector<8x128xf32>,
    %c0_i32_8 = arith.constant 0 : i32
    %9 = arith.cmpi eq, %arg2, %c0_i32_8 : i32
    %10 = arith.extui %9 : i1 to i32
    %c0_i32_9 = arith.constant 0 : i32
    %11 = arith.cmpi ne, %10, %c0_i32_9 : i32
    scf.if %11 {
      %c0_10 = arith.constant 0 : index
      %c0_11 = arith.constant 0 : index
      %12 = vector.load %arg6[%c0_10, %c0_11] : memref<8x128xf32, #tpu.memory_space<vmem>>, vector<8x128xf32>
      %c0_12 = arith.constant 0 : index
      %c0_13 = arith.constant 0 : index
      %13 = vector.load %arg5[%c0_12, %c0_13] : memref<1x128xf32, #tpu.memory_space<vmem>>, vector<1x128xf32>
      %14 = vector.broadcast %13 : vector<1x128xf32> to vector<8x128xf32>
      %15 = arith.addf %12, %14 : vector<8x128xf32>
      %cst_14 = arith.constant 0.000000e+00 : f32
      %16 = vector.broadcast %cst_14 : f32 to vector<8x128xf32>
      %17 = arith.maximumf %15, %16 : vector<8x128xf32>
      %c0_15 = arith.constant 0 : index
      %c0_16 = arith.constant 0 : index
      %18 = vector.load %arg6[%c0_15, %c0_16] : memref<8x128xf32, #tpu.memory_space<vmem>>, vector<8x128xf32>
      tpu.vector_store %arg6[%c0_15, %c0_16], %17 {strides = array<i32>} : memref<8x128xf32, #tpu.memory_space<vmem>>, vector<8x128xf32>,
    } else {
    }
    return
  }
  func.func @transform_0(%arg0: i32, %arg1: i32, %arg2: i32) -> (i32, i32) {
    %c0_i32 = arith.constant 0 : i32
    return %arg0, %arg2 : i32, i32
  }
  func.func @transform_1(%arg0: i32, %arg1: i32, %arg2: i32) -> (i32, i32) {
    %c0_i32 = arith.constant 0 : i32
    return %arg1, %arg2 : i32, i32
  }
  func.func @transform_2(%arg0: i32, %arg1: i32, %arg2: i32) -> (i32, i32) {
    %c0_i32 = arith.constant 0 : i32
    %c0_i32_0 = arith.constant 0 : i32
    return %c0_i32, %arg1 : i32, i32
  }
  func.func @transform_3(%arg0: i32, %arg1: i32, %arg2: i32) -> (i32, i32) {
    %c0_i32 = arith.constant 0 : i32
    return %arg0, %arg1 : i32, i32
  }
}

</mosaic_0001>

<bundles_post_ra>
// kernel: tpu_custom_call.1
= control target key start
LH: loop header
LB: loop body
LE: loop exit
PB: predicated region body
PF: predicated region fallthrough
CT: control target
= control target key end

     0   :  { %8 = vsyncpa [#allocation3], 0  ;;  %s1185_s0 = inlined_call_operand.hbm [shape: f32[16,32], index: 0, kind: input, shape index: {}]   ;;  %s1186_s1 = inlined_call_operand.hbm [shape: f32[32,32], index: 1, kind: input, shape index: {}]   ;;  %s1187_s2 = inlined_call_operand.hbm [shape: f32[1,32], index: 2, kind: input, shape index: {}]   ;;  %s1188_s3 = inlined_call_operand.hbm [shape: f32[16,32], index: 3, kind: output, shape index: {}]  }
   0x1   :  { %10 = vsyncpa [#allocation3 + $0x1], 0 }
   0x2   :  { %11 = vsyncpa [#allocation6], 0 }
   0x3   :  { %12 = vsyncpa [#allocation4], 0 }
   0x4   :  { %14 = vsyncpa [#allocation4 + $0x1], 0  ;;  %s938_s12 = smov 0   ;;  %s940_s13 = smov 0  }
   0x5   :  { %s942_s14 = smov 0   ;;  %s944_s15 = smov 0  }
   0x6   :  { %s946_s16 = smov 0   ;;  %s948_s17 = smov 0  }
   0x7 LB: > { %s969_s18 = sadd.s32 4294967295, %s907_s17   ;;  %s547_s19 = sadd.s32 4294967294, %s907_s17   ;;  %s907_s17 = sphi %s948_s17, %s20_s17   ;;  %s903_s16 = sphi %s946_s16, %s1212_s16   ;;  %s899_s15 = sphi %s944_s15, %s1211_s15   ;;  %s895_s14 = sphi %s942_s14, %s1210_s14   ;;  %s891_s13 = sphi %s940_s13, %s1209_s13   ;;  %s887_s12 = sphi %s938_s12, %s1208_s12  }
   0x8   : > { %s39_s20 = sadd.s32 1, %s903_s16  ;;  %s48_s21 = sadd.s32 1, %s895_s14 }
   0x9   : > { %p41_p0 = scmp.ge.s32.totalorder %s39_s20, 2  ;;  %p55_p1 = scmp.ne.s32.totalorder %s895_s14, %s891_s13 }
   0xa   : > { %p56_p2 = scmp.eq.s32.totalorder %s907_s17, 0  ;;  %p61_p3 = scmp.ne.s32.totalorder %s891_s13, %s887_s12 }
   0xb   : > { %s1214_s20 = smov (%p41_p0, %s39_s20), 0  ;;  %p62_p5 = scmp.eq.s32.totalorder %s969_s18, 0 }
   0xc   : > { %1193 = sst [smem:[#allocation12_spill]] %s1214_s20  ;;  %p981_p4 = por %p56_p2, %p55_p1 }
   0xd   : > { %s43_s23 = ssub.s32 %s903_s16, %s1214_s20  ;;  %p141_p6 = scmp.eq.s32.totalorder %s969_s18, 1 }
   0xe   : > { %p46_p7 = scmp.eq.s32.totalorder %s43_s23, 0  ;;  %p991_p8 = por %p62_p5, %p61_p3 }
   0xf   : > { %p995_p9 = por %p141_p6, %p55_p1  ;;  %p147_p10 = scmp.eq.s32.totalorder %s547_s19, 1 }
  0x10   : > { %s1195_s24 = scalar_select %p991_p8, 1, 0 }
  0x11   : > { %s1196_s25 = scalar_select %p995_p9, 1, 0 }
  0x12   : > { %s1000_s26 = scalar_select %p46_p7, %s895_s14, %s48_s21  }
  0x13   : > { %p1002_p11 = por %p147_p10, %p61_p3  ;;  %p548_p12 = scmp.ge.s32.totalorder %s907_s17, 1 }
  0x14   : > { %p154_p13 = scmp.lt.s32.totalorder %s907_s17, 3 }
  0x15   : > { %s1197_s27 = scalar_select %p1002_p11, 1, 0 }
  0x16   : > { %p1008_p0 = pnand %p548_p12, %p154_p13 }
  0x17   : > { %p549_p1 = scmp.ne.s32.totalorder (!%p1008_p0), %s969_s18, 0 }
  0x18   : > { %s1198_s28 = scalar_select %p1008_p0, 1, 0 }
  0x19   : > { %158 = sbr.rel (%p1008_p0) target bundleno = 78 (0x4e), region = 12 }
  0x20   : > { %162 = sbr.rel (%p549_p1) target bundleno = 57 (0x39), region = 16 }
  0x27   : > { %168 = vsyncadd [#allocation6], 1536  ;;  %s909_s29 = smov [#allocation5]   ;;  %s743_s6 = scalar_lea.hbm %s1186_s1, 512 }
  0x28   : > { %s174_s30 = sshll.u32 %s909_s29, 4  ;;  %p744_p2 = scmp.ne.s32.totalorder %s1186_s1, %s743_s6  ;;  %s175_s30 = int_to_ptr.vmem [resolvable:$true] %s174_s30 }
  0x29   : > { %p747_p3 = scmp.lt.u32.totalorder %s743_s6, %s1186_s1 }
  0x2b   : > { %p749_p6 = pnand %p747_p3, %p744_p2 }
  0x2d   : > { %752 = shalt.err (!%p749_p6)
}
  0x2e   : > { %s753_s11 = scalar_lea.vmem %s175_s30, 512  ;;  %s757_s19 = scalar_lea.vmem %s175_s30, 2048 }
  0x2f   : > { %p754_p7 = scmp.ne.s32.totalorder %s175_s30, %s753_s11  ;;  %p758_p10 = scmp.lt.s32.totalorder %s175_s30, %s175_s30 }
  0x30   : > { %p759_p12 = scmp.lt.s32.totalorder %s757_s19, %s753_s11 }
  0x32   : > { %p760_p13 = por %p759_p12, %p758_p10 }
  0x34   : > { %p761_p1 = pnand %p760_p13, %p754_p7 }
  0x36   : > { %764 = shalt.err (!%p761_p1)
}
  0x37   : > { %s910_s21 = smov 128   ;;  %s911_s23 = smov 8  }
  0x38   : > { %180 = dma.hbm_to_vmem [thread:$0]  %s1186_s1, 512, %s175_s30, [#allocation6], %s910_s21, %s910_s21, %s911_s23  }
  0x39 PF: > { %s912_s5 = smov [#allocation7]   ;;  %s765_s9 = scalar_lea.hbm %s1187_s2, 16 }
  0x3a   : > { %s190_s6 = sshll.u32 %s912_s5, 4  ;;  %p766_p2 = scmp.ne.s32.totalorder %s1187_s2, %s765_s9  ;;  %s191_s6 = int_to_ptr.vmem [resolvable:$true] %s190_s6 }
  0x3b   : > { %p771_p7 = scmp.lt.u32.totalorder %s765_s9, %s1187_s2 }
  0x3c   : > { %p767_p3 = pnand %p766_p2, %p62_p5 }
  0x3e   : > { %p768_p6 = pneg %p767_p3 }
  0x40   : > { %p773_p10 = pnand %p771_p7, %p768_p6 }
  0x42   : > { %776 = shalt.err (!%p773_p10)
}
  0x43   : > { %s777_s30 = scalar_lea.vmem %s191_s6, 16  ;;  %s783_s21 = scalar_lea.vmem %s191_s6, 32 }
  0x44   : > { %p778_p12 = scmp.ne.s32.totalorder %s191_s6, %s777_s30  ;;  %p784_p11 = scmp.lt.s32.totalorder %s191_s6, %s191_s6 }
  0x45   : > { %p785_p9 = scmp.lt.s32.totalorder %s783_s21, %s777_s30 }
  0x46   : > { %p779_p13 = pnand %p778_p12, %p62_p5 }
  0x47   : > { %p786_p8 = por %p785_p9, %p784_p11 }
  0x48   : > { %p780_p1 = pneg %p779_p13 }
  0x4a   : > { %p787_p0 = pnand %p786_p8, %p780_p1 }
  0x4c   : > { %790 = shalt.err (!%p787_p0)
}
  0x4d   : > { %666 = dma.hbm_to_vmem [thread:$0]  (%p62_p5), %s1187_s2, 16, %s191_s6, [#allocation6]  }
  0x4e PF: > { %p684_p3 = scmp.lt.s32.totalorder %s907_s17, 2  ;;  %s201_s20 = sand.u32 1, %s895_s14  }
  0x4f   : > { %s553_s4 = sshll.u32 %s903_s16, 7  ;;  %s552_s5 = sshll.u32 %s201_s20, 3 }
  0x50   : > { %s1052_s9 = scalar_lea.hbm %s1185_s0, %s553_s4  ;;  %s205_s6 = scalar_lea.vmem [#allocation2], %s552_s5 }
  0x51   : > { %s213_s10 = sshll.u32 %s205_s6, 4  ;;  %p1056_p8 = pnand %p684_p3, %p981_p4  ;;  %s1060_s10 = int_to_ptr.vmem [resolvable:$true] %s213_s10 }
  0x52   : > { %s202_s19 = scalar_lea.sflag [#allocation3], %s201_s20  ;;  %s791_s30 = scalar_lea.hbm %s1052_s9, 128 }
  0x53   : > { %p792_p9 = scmp.ne.s32.totalorder %s1052_s9, %s791_s30  ;;  %p793_p11 = pneg %p1056_p8 }
  0x54   : > { %s796_s22 = scalar_lea.hbm %s1185_s0, 256  ;;  %p797_p4 = scmp.lt.u32.totalorder %s1052_s9, %s1185_s0 }
  0x55   : > { %p794_p0 = pnand %p793_p11, %p792_p9  ;;  %p798_p7 = scmp.lt.u32.totalorder %s796_s22, %s791_s30 }
  0x56   : > { %p800_p12 = scmp.lt.u32.totalorder %s791_s30, %s1052_s9 }
  0x57   : > { %p795_p6 = pneg %p794_p0  ;;  %p799_p10 = por %p798_p7, %p797_p4 }
  0x59   : > { %p801_p13 = por %p800_p12, %p799_p10 }
  0x5b   : > { %p802_p1 = pnand %p801_p13, %p795_p6 }
  0x5d   : > { %805 = shalt.err (!%p802_p1)
}
  0x5e   : > { %s806_s20 = scalar_lea.vmem %s1060_s10, 128  ;;  %s913_s5 = smov [#allocation2]  }
  0x5f   : > { %p807_p3 = scmp.ne.s32.totalorder %s1060_s10, %s806_s20  ;;  %s811_s7 = sshll.u32 %s913_s5, 4  ;;  %s812_s7 = int_to_ptr.vmem [resolvable:$false] %s811_s7 }
  0x60   : > { %s813_s8 = scalar_lea.vmem %s812_s7, 256  ;;  %p814_p2 = scmp.lt.s32.totalorder %s1060_s10, %s812_s7 }
  0x61   : > { %p809_p9 = pnand %p807_p3, %p793_p11  ;;  %p815_p4 = scmp.lt.s32.totalorder %s813_s8, %s806_s20 }
  0x63   : > { %p810_p0 = pneg %p809_p9  ;;  %p816_p7 = por %p815_p4, %p814_p2 }
  0x65   : > { %p817_p10 = pnand %p816_p7, %p810_p0 }
  0x67   : > { %820 = shalt.err (!%p817_p10)
}
  0x68   : > { %678 = dma.hbm_to_vmem [thread:$0]  (!%p1056_p8), %s1052_s9, 128, %s1060_s10, %s202_s19  }
  0x69   : > { %p1200_p6 = scmp.ne.s32.totalorder %s1198_s28, 0 }
  0x6a   : > { %s1090_s6 = sand.u32 (!%p1200_p6), 1, %s891_s13   ;;  %p1201_p2 = scmp.ne.s32.totalorder (!%p1200_p6), %s1195_s24, 0 }
  0x6b   : > { %222 = sbr.rel (%p1200_p6) target bundleno = 414 (0x19e), region = 32  ;;  %s555_s30 = sshll.u32 (!%p1200_p6), %s1090_s6, 3 }
  0x6c   : > { %s225_s21 = scalar_lea.sflag (!%p1200_p6), [#allocation3], %s1090_s6  ;;  %s1096_s23 = scalar_lea.vmem (!%p1200_p6), [#allocation2], %s555_s30 }
  0x72   : > { %874 = dma.done.wait (%p1201_p2), %s225_s21, 128  }
  0x73   : > { %876 = vsyncadd (%p1201_p2), %s225_s21, 4294967168 }
  0x74   : > { %878 = dma.done.wait (%p62_p5), [#allocation6], 2064  }
  0x75   : > { %880 = vsyncadd (%p62_p5), [#allocation6], 4294965232  ;;  %v914_v0 = vmov 0.0|0.0   ;;  %vm915_vm0 = vmmov 0   ;;  %v916_v1 = vmov 0.0   ;;  %vm285_vm1 = vcmask 261120  }
  0x76   : > { %633 = vmatprep.subr.bf16.mxu0 %v914_v0  ;;  %630 = vmatprep.mubr.msk.f32.mxu0 %vm915_vm0, %v916_v1  ;;  %v269_v2 = vld [vmem:[#allocation5] sm:$0xff]  ;;  %v270_v3 = vld [vmem:[#allocation5 + $0x8] sm:$0xff]  ;;  %vm1108_vm2 = vmpackc.low %vm285_vm1, %vm285_vm1  ;;  %s578_s18 = sshll.u32 %s899_s15, 7  ;;  %s258_s24 = scalar_lea.vmem [#allocation8], %s555_s30 }
  0x77   : > { %v634_v5 = vpack.c.bf16 %v270_v3, %v269_v2  ;;  %v271_v6 = vld [vmem:[#allocation5 + $0x10] sm:$0xff]  ;;  %v272_v7 = vld [vmem:[#allocation5 + $0x18] sm:$0xff]  ;;  %v273_v9 = vld [vmem:[#allocation5 + $0x20] sm:$0xff]  ;;  %s438_s28 = sshll.u32 %s258_s24, 4  ;;  %s1136_s11 = scalar_lea.hbm %s1188_s3, %s578_s18  ;;  %s1138_s28 = int_to_ptr.vmem [resolvable:$true] %s438_s28 }
  0x78   : > { %v638_v8 = vpack.c.bf16 %v272_v7, %v271_v6  ;;  %v274_v10 = vld [vmem:[#allocation5 + $0x28] sm:$0xff]  ;;  %v275_v12 = vld [vmem:[#allocation5 + $0x30] sm:$0xff]  ;;  %v276_v13 = vld [vmem:[#allocation5 + $0x38] sm:$0xff]  ;;  %s424_s19 = scalar_lea.sflag [#allocation4], %s1090_s6  ;;  %s821_s22 = scalar_lea.vmem %s1138_s28, 128 }
  0x79   : > { %636 = vmatpush3.bf16.xpose.msk.msra.mxu0 %vm1108_vm2, %v634_v5  ;;  %v642_v11 = vpack.c.bf16 %v274_v10, %v273_v9  ;;  %v646_v14 = vpack.c.bf16 %v276_v13, %v275_v12  ;;  %v277_v15 = vld [vmem:[#allocation5 + $0x40] sm:$0xff]  ;;  %v278_v16 = vld [vmem:[#allocation5 + $0x48] sm:$0xff]  ;;  %v279_v18 = vld [vmem:[#allocation5 + $0x50] sm:$0xff]  ;;  %p822_p5 = scmp.ne.s32.totalorder %s1138_s28, %s821_s22  ;;  %p1204_p8 = scmp.ne.s32.totalorder %s1196_s25, 0 }
  0x7a   : > { %637 = vmatprep.subr.bf16.mxu0 %v914_v0  ;;  %v650_v17 = vpack.c.bf16 %v278_v16, %v277_v15  ;;  %v280_v19 = vld [vmem:[#allocation5 + $0x58] sm:$0xff]  ;;  %v281_v21 = vld [vmem:[#allocation5 + $0x60] sm:$0xff]  ;;  %v282_v22 = vld [vmem:[#allocation5 + $0x68] sm:$0xff]  ;;  %s917_s15 = smov [#allocation8]  }
  0x7b   : > { %v654_v20 = vpack.c.bf16 %v280_v19, %v279_v18  ;;  %v658_v23 = vpack.c.bf16 %v282_v22, %v281_v21  ;;  %v283_v24 = vld [vmem:[#allocation5 + $0x70] sm:$0xff]  ;;  %v284_v25 = vld [vmem:[#allocation5 + $0x78] sm:$0xff]  ;;  %v576_v29 = vld [vmem:[#allocation7] ss:$0 sm:$0xff]  ;;  %p823_p11 = pnand %p822_p5, %p1204_p8  ;;  %s825_s29 = sshll.u32 %s917_s15, 4  ;;  %s826_s29 = int_to_ptr.vmem [resolvable:$false] %s825_s29 }
  0x7c   : > { %v662_v26 = vpack.c.bf16 %v284_v25, %v283_v24  ;;  %v268_v27 = vld [vmem:[%s1096_s23] sm:$0xff]  ;;  %s827_s4 = scalar_lea.vmem %s826_s29, 256  ;;  %p828_p13 = scmp.lt.s32.totalorder %s1138_s28, %s826_s29 }
  0x7d   : > { %p824_p12 = pneg %p823_p11  ;;  %p829_p1 = scmp.lt.s32.totalorder %s827_s4, %s821_s22 }
  0x7f   : > { %p830_p3 = por %p829_p1, %p828_p13 }
  0x81   : > { %640 = vmatpush3.bf16.xpose.msk.msra.mxu0 %vm1108_vm2, %v638_v8  ;;  %p831_p9 = pnand %p830_p3, %p824_p12 }
  0x82   : > { %641 = vmatprep.subr.bf16.mxu0 %v914_v0 }
  0x89   : > { %644 = vmatpush3.bf16.xpose.msk.msra.mxu0 %vm1108_vm2, %v642_v11 }
  0x8a   : > { %645 = vmatprep.subr.bf16.mxu0 %v914_v0 }
  0x91   : > { %648 = vmatpush3.bf16.xpose.msk.msra.mxu0 %vm1108_vm2, %v646_v14 }
  0x92   : > { %649 = vmatprep.subr.bf16.mxu0 %v914_v0 }
  0x99   : > { %652 = vmatpush3.bf16.xpose.msk.msra.mxu0 %vm1108_vm2, %v650_v17 }
  0x9a   : > { %653 = vmatprep.subr.bf16.mxu0 %v914_v0 }
  0xa1   : > { %656 = vmatpush3.bf16.xpose.msk.msra.mxu0 %vm1108_vm2, %v654_v20 }
  0xa2   : > { %657 = vmatprep.subr.bf16.mxu0 %v914_v0 }
  0xa9   : > { %660 = vmatpush3.bf16.xpose.msk.msra.mxu0 %vm1108_vm2, %v658_v23 }
  0xaa   : > { %661 = vmatprep.subr.bf16.mxu0 %v914_v0 }
  0xb1   : > { %664 = vmatpush3.bf16.xpose.msk.msra.mxu0 %vm1108_vm2, %v662_v26 }
  0xb8   : > { %631 = vmatmul.mubr.msk.f32.vlgmr.msra.gmra.mrb[0].mxu0 %vm285_vm1, %v268_v27 }
 0x18b   : > { %v403_v28 = vpop.f32.mrb[0].mxu0 }
 0x18c   : > { %v632_v30 = vpop.f32.mrb[1].mxu0  ;;  %v420_v31 = vadd.f32 %v576_v29, %v403_v28 }
 0x18e   : > { %v421_v32 = vmax.f32 %v420_v31, 0.0 }
 0x190   : > { %422 = vst [vmem:[%s258_s24] sm:$0xff] %v421_v32 }
 0x191   : > { %834 = shalt.err (!%p831_p9)
}
 0x192   : > { %s835_s20 = scalar_lea.hbm %s1136_s11, 128  ;;  %s839_s8 = scalar_lea.hbm %s1188_s3, 256 }
 0x193   : > { %p836_p0 = scmp.ne.s32.totalorder %s1136_s11, %s835_s20  ;;  %p840_p10 = scmp.lt.u32.totalorder %s1136_s11, %s1188_s3 }
 0x194   : > { %p841_p6 = scmp.lt.u32.totalorder %s839_s8, %s835_s20  ;;  %p843_p5 = scmp.lt.u32.totalorder %s835_s20, %s1136_s11 }
 0x195   : > { %p837_p4 = pnand %p836_p0, %p1204_p8 }
 0x196   : > { %p842_p2 = por %p841_p6, %p840_p10 }
 0x197   : > { %p838_p7 = pneg %p837_p4 }
 0x198   : > { %p844_p11 = por %p843_p5, %p842_p2 }
 0x19a   : > { %p845_p12 = pnand %p844_p11, %p838_p7 }
 0x19c   : > { %848 = shalt.err (!%p845_p12)
}
 0x19d   : > { %673 = dma.vmem_to_hbm [thread:$0]  (%p1204_p8), %s1138_s28, 128, %s1136_s11, %s424_s19  }
 0x19e PF: > { %s450_s21 = sand.u32 1, %s887_s12   ;;  %p1205_p13 = scmp.ne.s32.totalorder %s1197_s27, 0 }
 0x19f   : > { %p1206_p1 = scmp.ge.s32.totalorder %s907_s17, 2  ;;  %s451_s23 = scalar_lea.sflag [#allocation4], %s450_s21 }
 0x1a1   : > { %p680_p3 = pnand %p1206_p1, %p1205_p13 }
 0x1a3   : > { %882 = dma.done.wait (!%p680_p3), %s451_s23, 128  }
 0x1a4   : > { %884 = vsyncadd (!%p680_p3), %s451_s23, 4294967168  ;;  %s20_s17 = sadd.s32 1, %s907_s17   ;;  %s1207_s25 = sld [smem:[#allocation12_spill]] }
 0x1a5   : > { %p17_p9 = scmp.ge.s32.totalorder %s20_s17, 4   ;;  %s1208_s12 = smov %s891_s13 }
 0x1a6   : > { %s1209_s13 = smov %s895_s14  ;;  %s1210_s14 = smov %s1000_s26 }
 0x1a7   : > { %s1211_s15 = smov %s903_s16  ;;  %19 = sbr.rel (!%p17_p9) target bundleno = 7 (0x7), region = 95 }
 0x1aa   : > { %s1212_s16 = smov %s1207_s25 }
 0x1ae   :  { %456 = vsyncpa [#allocation3], 1 }
 0x1af   :  { %458 = vsyncpa [#allocation3 + $0x1], 1 }
 0x1b0   :  { %459 = vsyncpa [#allocation6], 1 }
 0x1b1   :  { %460 = vsyncpa [#allocation4], 1 }
 0x1b2   :  { %462 = vsyncpa [#allocation4 + $0x1], 1 }

</bundles_post_ra>
